<compile_context>
chip_gen: v7x
topology: tpu7x:2x2x1
jax: 0.10.0
libtpu: 0.0.40
codegen_flags: <defaults>
</compile_context>

<pallas_src>
import functools

import jax
import jax.numpy as jnp
from jax.experimental import pallas as pl
from jax.experimental.pallas import tpu as pltpu

_LANE = 128       # TPU lane width (last dim of every lane-dense block)
_SUBLANE = 8      # f32 sublane packing (second-to-last dim)
_NEG_INF = -1e30  # bias for padded output lanes -> exp underflows to exactly 0.0


def _round_up(n, m):
    return ((n + m - 1) // m) * m


def _mlp_kernel(*refs):
    """Fused forward for one batch tile.

    refs = (x_ref, w0_ref, b0_ref, w1_ref, b1_ref, ..., o_ref)

    Weights are (in, out_pad) with zero-padded extra rows/cols; biases are
    (1, out_pad) with -1e30 in padded lanes, so every softmax over the padded
    lane axis equals the softmax over the real features and padded activation
    lanes stay exactly 0 through the whole network.
    """
    x_ref = refs[0]
    o_ref = refs[-1]
    wb_refs = refs[1:-1]

    x = x_ref[...].astype(jnp.float32)                        # (Bt, D_in)
    for i in range(0, len(wb_refs), 2):                       # unrolled layer loop
        w = wb_refs[i][...]                                    # (D_in, D_out_pad)
        b = wb_refs[i + 1][...]                                # (1,   D_out_pad)
        # MXU matmul with f32 accumulation; weights already (in, out) -> no
        # in-kernel transpose.  If weights were prepared in bf16, feed the MXU
        # bf16 x bf16 (still accumulating in f32).
        y = jnp.dot(x.astype(w.dtype), w, preferred_element_type=jnp.float32) + b
        # Numerically-stable softmax along the lane (feature) axis.
        m = jnp.max(y, axis=-1, keepdims=True)
        e = jnp.exp(y - m)                                     # padded lanes -> 0.0
        s = jnp.sum(e, axis=-1, keepdims=True)
        x = e * pl.reciprocal(s, approx=False)                 # exact: keeps 1e-5 tol
    o_ref[...] = x.astype(o_ref.dtype)


def init_params(key, input_size, hidden_size, hidden_layer, output_size):
    """PyTorch-style Linear init: W (out, in), b (out,), U(-1/sqrt(in), 1/sqrt(in))."""
    dims = [input_size] + [hidden_size] * (hidden_layer + 1) + [output_size]
    params = []
    for i in range(len(dims) - 1):
        fan_in, fan_out = dims[i], dims[i + 1]
        key, kw, kb = jax.random.split(key, 3)
        bound = 1.0 / (fan_in ** 0.5)
        w = jax.random.uniform(kw, (fan_out, fan_in), jnp.float32, -bound, bound)
        b = jax.random.uniform(kb, (fan_out,), jnp.float32, -bound, bound)
        params.append((w, b))
    return params


def prepare_params(params, weight_dtype=jnp.float32):
    """One-time param prep (hoisted out of the forward path).

    - transpose W from PyTorch (out, in) to (in, out)
    - pad output feature dims to multiples of 128 lanes (zeros)
    - the FIRST layer keeps the raw input width so x needs no feature padding;
      later layers pad their input rows (zeros) to the previous layer's out_pad
    - bias as (1, out_pad) with padded lanes = -1e30 (masked out by softmax)
    - optionally cast weights to bf16 (breaks the 1e-5 tolerance; off by default)
    """
    prepared = []
    prev_out_pad = None
    for idx, (w, b) in enumerate(params):
        out_f, in_f = w.shape
        in_dim = in_f if idx == 0 else prev_out_pad      # chain padded widths
        out_pad = _round_up(out_f, _LANE)
        w_p = jnp.zeros((in_dim, out_pad), jnp.float32).at[:in_f, :out_f].set(w.T)
        w_p = w_p.astype(weight_dtype)
        b_p = jnp.full((1, out_pad), _NEG_INF, jnp.float32).at[0, :out_f].set(b)
        prepared.append((w_p, b_p))
        prev_out_pad = out_pad
    return prepared


@functools.partial(jax.jit, static_argnames=("output_size",))
def full_connected_forward(x, prepared, output_size):
    """Whole network as a single fused pallas_call, tiled only over batch."""
    batch, in_f = x.shape
    out_pad = prepared[-1][1].shape[1]

    # Batch tiling: up to 256 rows per tile (fills the 2x256^2 MXU M-dim on
    # v6e/v7x); grid axis is "parallel" for megacore sharding.
    block_b = min(256, _round_up(batch, _SUBLANE))
    batch_pad = _round_up(batch, block_b)

    # Pad the batch only when it is ragged (no-op at the demo size); the feature
    # dim is never padded — the first-layer weight keeps the raw input width.
    if batch_pad != batch:
        x_in = jnp.zeros((batch_pad, in_f), x.dtype).at[:batch, :].set(x)
    else:
        x_in = x

    flat_inputs = [x_in]
    in_specs = [pl.BlockSpec((block_b, in_f), lambda i: (i, 0))]
    for w_p, b_p in prepared:
        flat_inputs += [w_p, b_p]
        # Constant index_map -> block stays resident in VMEM across batch grid
        # steps; Buffered(1) -> a single VMEM buffer (no pointless double-buffer
        # for a block whose index never changes).
        in_specs.append(
            pl.BlockSpec(w_p.shape, lambda i: (0, 0), pipeline_mode=pl.Buffered(1)))
        in_specs.append(
            pl.BlockSpec(b_p.shape, lambda i: (0, 0), pipeline_mode=pl.Buffered(1)))

    # --- VMEM budget: resident params (single-buffered) + double-buffered x/out
    #     tiles + per-layer intermediates, with ~30% headroom. ---
    param_bytes = sum(
        w.size * w.dtype.itemsize + b.size * b.dtype.itemsize for w, b in prepared)
    max_feat = max([in_f] + [w.shape[1] for w, _ in prepared])
    io_bytes = 2 * block_b * in_f * 4 + 2 * block_b * out_pad * 4
    scratch_bytes = 4 * block_b * max_feat * 4
    vmem_limit = int(1.3 * (param_bytes + io_bytes + scratch_bytes)) + (2 << 20)
    vmem_limit = min(max(vmem_limit, 16 << 20), 100 << 20)

    # --- Advisory cost estimate so XLA schedules the surrounding ops sensibly. ---
    flops = 2 * batch_pad * sum(w.shape[0] * w.shape[1] for w, _ in prepared)
    transcendentals = batch_pad * sum(w.shape[1] for w, _ in prepared)
    bytes_accessed = int(param_bytes
                         + batch_pad * in_f * 4
                         + batch_pad * out_pad * 4)

    out_padded = pl.pallas_call(
        _mlp_kernel,
        out_shape=jax.ShapeDtypeStruct((batch_pad, out_pad), jnp.float32),
        grid=(batch_pad // block_b,),
        in_specs=in_specs,
        out_specs=pl.BlockSpec((block_b, out_pad), lambda i: (i, 0)),
        compiler_params=pltpu.CompilerParams(
            dimension_semantics=("parallel",),
            vmem_limit_bytes=vmem_limit,
        ),
        cost_estimate=pl.CostEstimate(
            flops=int(flops),
            transcendentals=int(transcendentals),
            bytes_accessed=bytes_accessed,
        ),
    )(*flat_inputs)

    # Strip batch / lane padding (padded output lanes are exactly 0; both slices
    # are no-ops when batch and output_size are already aligned).
    return out_padded[:batch, :output_size]


def reference_forward(x, params):
    """Pure-JAX reference for correctness checking (PyTorch semantics)."""
    for w, b in params:
        x = jax.nn.softmax(x @ w.T + b, axis=1)
    return x


if __name__ == "__main__":
    # Small shapes consistent with the module's forward (2D input: batch x features).
    batch = 8
    input_size = 32
    hidden_size = 32
    hidden_layer = 2
    output_size = 16

    key = jax.random.PRNGKey(0)
    key, kx = jax.random.split(key)
    x = jax.random.normal(kx, (batch, input_size), jnp.float32)

    params = init_params(key, input_size, hidden_size, hidden_layer, output_size)
    # One-time: transpose + lane padding + bias reshape.  (Pass
    # weight_dtype=jnp.bfloat16 for the v6e/v7x throughput mode; it relaxes the
    # 1e-5 tolerance, so it is off for this correctness-checked demo.)
    prepared = prepare_params(params, weight_dtype=jnp.float32)

    out = full_connected_forward(x, prepared, output_size)
    out = jax.block_until_ready(out)

    ref = reference_forward(x, params)
    assert out.shape == (batch, output_size)
    assert jnp.allclose(out, ref, atol=1e-5, rtol=1e-5), "mismatch vs reference"
    # rows of the final softmax output must sum to 1
    assert jnp.allclose(jnp.sum(out, axis=1), jnp.ones(batch), atol=1e-5)

    print("KERNEL_OK")
</pallas_src>

<mosaic_0001>
module attributes {stable_mosaic.version = 11 : i64} {
  func.func @_mlp_kernel(%arg0: i32, %arg1: memref<8x32xf32, #tpu.memory_space<vmem>>, %arg2: memref<32x128xf32, #tpu.memory_space<vmem>>, %arg3: memref<1x128xf32, #tpu.memory_space<vmem>>, %arg4: memref<128x128xf32, #tpu.memory_space<vmem>>, %arg5: memref<1x128xf32, #tpu.memory_space<vmem>>, %arg6: memref<128x128xf32, #tpu.memory_space<vmem>>, %arg7: memref<1x128xf32, #tpu.memory_space<vmem>>, %arg8: memref<128x128xf32, #tpu.memory_space<vmem>>, %arg9: memref<1x128xf32, #tpu.memory_space<vmem>>, %arg10: memref<8x128xf32, #tpu.memory_space<vmem>>) attributes {dimension_semantics = [#tpu.dimension_semantics<parallel>], iteration_bounds = array<i64: 1>, scalar_prefetch = 0 : i64, scratch_operands = 0 : i64, tpu.core_type = #tpu.core_type<tc>, window_params = [{transform_indices = @transform_0, window_bounds = array<i64: 8, 32>}, {pipeline_mode = #tpu.pipeline_mode<synchronous>, transform_indices = @transform_1, window_bounds = array<i64: 32, 128>}, {pipeline_mode = #tpu.pipeline_mode<synchronous>, transform_indices = @transform_2, window_bounds = array<i64: 1, 128>}, {pipeline_mode = #tpu.pipeline_mode<synchronous>, transform_indices = @transform_3, window_bounds = array<i64: 128, 128>}, {pipeline_mode = #tpu.pipeline_mode<synchronous>, transform_indices = @transform_4, window_bounds = array<i64: 1, 128>}, {pipeline_mode = #tpu.pipeline_mode<synchronous>, transform_indices = @transform_5, window_bounds = array<i64: 128, 128>}, {pipeline_mode = #tpu.pipeline_mode<synchronous>, transform_indices = @transform_6, window_bounds = array<i64: 1, 128>}, {pipeline_mode = #tpu.pipeline_mode<synchronous>, transform_indices = @transform_7, window_bounds = array<i64: 128, 128>}, {pipeline_mode = #tpu.pipeline_mode<synchronous>, transform_indices = @transform_8, window_bounds = array<i64: 1, 128>}, {transform_indices = @transform_9, window_bounds = array<i64: 8, 128>}]} {
    %c0 = arith.constant 0 : index
    %c0_0 = arith.constant 0 : index
    %0 = vector.load %arg1[%c0, %c0_0] : memref<8x32xf32, #tpu.memory_space<vmem>>, vector<8x32xf32>
    %c0_1 = arith.constant 0 : index
    %c0_2 = arith.constant 0 : index
    %1 = vector.load %arg2[%c0_1, %c0_2] : memref<32x128xf32, #tpu.memory_space<vmem>>, vector<32x128xf32>
    %c0_3 = arith.constant 0 : index
    %c0_4 = arith.constant 0 : index
    %2 = vector.load %arg3[%c0_3, %c0_4] : memref<1x128xf32, #tpu.memory_space<vmem>>, vector<1x128xf32>
    %cst = arith.constant dense<0.000000e+00> : vector<8x128xf32>
    %3 = tpu.matmul %0, %1, %cst {dimension_numbers = #tpu.dot_dimension_numbers<[1], [0], [0], [1], [0, 0, 1, 1], [], []>} : vector<8x32xf32>, vector<32x128xf32>, vector<8x128xf32> -> vector<8x128xf32>
    %4 = vector.broadcast %2 : vector<1x128xf32> to vector<8x128xf32>
    %5 = arith.addf %3, %4 : vector<8x128xf32>
    %cst_5 = arith.constant dense<0xFF800000> : vector<8xf32>
    %6 = vector.multi_reduction <maximumf>, %5, %cst_5 [1] : vector<8x128xf32> to vector<8xf32>
    %7 = vector.shape_cast %6 : vector<8xf32> to vector<8x1xf32>
    %8 = vector.broadcast %7 : vector<8x1xf32> to vector<8x128xf32>
    %9 = arith.subf %5, %8 : vector<8x128xf32>
    %10 = math.exp %9 : vector<8x128xf32>
    %cst_6 = arith.constant dense<0.000000e+00> : vector<8xf32>
    %11 = vector.multi_reduction <add>, %10, %cst_6 [1] : vector<8x128xf32> to vector<8xf32>
    %12 = vector.shape_cast %11 : vector<8xf32> to vector<8x1xf32>
    %13 = tpu.reciprocal %12 : vector<8x1xf32> -> vector<8x1xf32>
    %14 = vector.broadcast %13 : vector<8x1xf32> to vector<8x128xf32>
    %15 = arith.mulf %10, %14 : vector<8x128xf32>
    %c0_7 = arith.constant 0 : index
    %c0_8 = arith.constant 0 : index
    %16 = vector.load %arg4[%c0_7, %c0_8] : memref<128x128xf32, #tpu.memory_space<vmem>>, vector<128x128xf32>
    %c0_9 = arith.constant 0 : index
    %c0_10 = arith.constant 0 : index
    %17 = vector.load %arg5[%c0_9, %c0_10] : memref<1x128xf32, #tpu.memory_space<vmem>>, vector<1x128xf32>
    %cst_11 = arith.constant dense<0.000000e+00> : vector<8x128xf32>
    %18 = tpu.matmul %15, %16, %cst_11 {dimension_numbers = #tpu.dot_dimension_numbers<[1], [0], [0], [1], [0, 0, 1, 1], [], []>} : vector<8x128xf32>, vector<128x128xf32>, vector<8x128xf32> -> vector<8x128xf32>
    %19 = vector.broadcast %17 : vector<1x128xf32> to vector<8x128xf32>
    %20 = arith.addf %18, %19 : vector<8x128xf32>
    %cst_12 = arith.constant dense<0xFF800000> : vector<8xf32>
    %21 = vector.multi_reduction <maximumf>, %20, %cst_12 [1] : vector<8x128xf32> to vector<8xf32>
    %22 = vector.shape_cast %21 : vector<8xf32> to vector<8x1xf32>
    %23 = vector.broadcast %22 : vector<8x1xf32> to vector<8x128xf32>
    %24 = arith.subf %20, %23 : vector<8x128xf32>
    %25 = math.exp %24 : vector<8x128xf32>
    %cst_13 = arith.constant dense<0.000000e+00> : vector<8xf32>
    %26 = vector.multi_reduction <add>, %25, %cst_13 [1] : vector<8x128xf32> to vector<8xf32>
    %27 = vector.shape_cast %26 : vector<8xf32> to vector<8x1xf32>
    %28 = tpu.reciprocal %27 : vector<8x1xf32> -> vector<8x1xf32>
    %29 = vector.broadcast %28 : vector<8x1xf32> to vector<8x128xf32>
    %30 = arith.mulf %25, %29 : vector<8x128xf32>
    %c0_14 = arith.constant 0 : index
    %c0_15 = arith.constant 0 : index
    %31 = vector.load %arg6[%c0_14, %c0_15] : memref<128x128xf32, #tpu.memory_space<vmem>>, vector<128x128xf32>
    %c0_16 = arith.constant 0 : index
    %c0_17 = arith.constant 0 : index
    %32 = vector.load %arg7[%c0_16, %c0_17] : memref<1x128xf32, #tpu.memory_space<vmem>>, vector<1x128xf32>
    %cst_18 = arith.constant dense<0.000000e+00> : vector<8x128xf32>
    %33 = tpu.matmul %30, %31, %cst_18 {dimension_numbers = #tpu.dot_dimension_numbers<[1], [0], [0], [1], [0, 0, 1, 1], [], []>} : vector<8x128xf32>, vector<128x128xf32>, vector<8x128xf32> -> vector<8x128xf32>
    %34 = vector.broadcast %32 : vector<1x128xf32> to vector<8x128xf32>
    %35 = arith.addf %33, %34 : vector<8x128xf32>
    %cst_19 = arith.constant dense<0xFF800000> : vector<8xf32>
    %36 = vector.multi_reduction <maximumf>, %35, %cst_19 [1] : vector<8x128xf32> to vector<8xf32>
    %37 = vector.shape_cast %36 : vector<8xf32> to vector<8x1xf32>
    %38 = vector.broadcast %37 : vector<8x1xf32> to vector<8x128xf32>
    %39 = arith.subf %35, %38 : vector<8x128xf32>
    %40 = math.exp %39 : vector<8x128xf32>
    %cst_20 = arith.constant dense<0.000000e+00> : vector<8xf32>
    %41 = vector.multi_reduction <add>, %40, %cst_20 [1] : vector<8x128xf32> to vector<8xf32>
    %42 = vector.shape_cast %41 : vector<8xf32> to vector<8x1xf32>
    %43 = tpu.reciprocal %42 : vector<8x1xf32> -> vector<8x1xf32>
    %44 = vector.broadcast %43 : vector<8x1xf32> to vector<8x128xf32>
    %45 = arith.mulf %40, %44 : vector<8x128xf32>
    %c0_21 = arith.constant 0 : index
    %c0_22 = arith.constant 0 : index
    %46 = vector.load %arg8[%c0_21, %c0_22] : memref<128x128xf32, #tpu.memory_space<vmem>>, vector<128x128xf32>
    %c0_23 = arith.constant 0 : index
    %c0_24 = arith.constant 0 : index
    %47 = vector.load %arg9[%c0_23, %c0_24] : memref<1x128xf32, #tpu.memory_space<vmem>>, vector<1x128xf32>
    %cst_25 = arith.constant dense<0.000000e+00> : vector<8x128xf32>
    %48 = tpu.matmul %45, %46, %cst_25 {dimension_numbers = #tpu.dot_dimension_numbers<[1], [0], [0], [1], [0, 0, 1, 1], [], []>} : vector<8x128xf32>, vector<128x128xf32>, vector<8x128xf32> -> vector<8x128xf32>
    %49 = vector.broadcast %47 : vector<1x128xf32> to vector<8x128xf32>
    %50 = arith.addf %48, %49 : vector<8x128xf32>
    %cst_26 = arith.constant dense<0xFF800000> : vector<8xf32>
    %51 = vector.multi_reduction <maximumf>, %50, %cst_26 [1] : vector<8x128xf32> to vector<8xf32>
    %52 = vector.shape_cast %51 : vector<8xf32> to vector<8x1xf32>
    %53 = vector.broadcast %52 : vector<8x1xf32> to vector<8x128xf32>
    %54 = arith.subf %50, %53 : vector<8x128xf32>
    %55 = math.exp %54 : vector<8x128xf32>
    %cst_27 = arith.constant dense<0.000000e+00> : vector<8xf32>
    %56 = vector.multi_reduction <add>, %55, %cst_27 [1] : vector<8x128xf32> to vector<8xf32>
    %57 = vector.shape_cast %56 : vector<8xf32> to vector<8x1xf32>
    %58 = tpu.reciprocal %57 : vector<8x1xf32> -> vector<8x1xf32>
    %59 = vector.broadcast %58 : vector<8x1xf32> to vector<8x128xf32>
    %60 = arith.mulf %55, %59 : vector<8x128xf32>
    %c0_28 = arith.constant 0 : index
    %c0_29 = arith.constant 0 : index
    %61 = vector.load %arg10[%c0_28, %c0_29] : memref<8x128xf32, #tpu.memory_space<vmem>>, vector<8x128xf32>
    tpu.vector_store %arg10[%c0_28, %c0_29], %60 {strides = array<i32>} : memref<8x128xf32, #tpu.memory_space<vmem>>, vector<8x128xf32>,
    return
  }
  func.func @transform_0(%arg0: i32) -> (i32, i32) {
    %c0_i32 = arith.constant 0 : i32
    %c0_i32_0 = arith.constant 0 : i32
    return %arg0, %c0_i32 : i32, i32
  }
  func.func @transform_1(%arg0: i32) -> (i32, i32) {
    %c0_i32 = arith.constant 0 : i32
    %c0_i32_0 = arith.constant 0 : i32
    %c0_i32_1 = arith.constant 0 : i32
    return %c0_i32, %c0_i32_0 : i32, i32
  }
  func.func @transform_2(%arg0: i32) -> (i32, i32) {
    %c0_i32 = arith.constant 0 : i32
    %c0_i32_0 = arith.constant 0 : i32
    %c0_i32_1 = arith.constant 0 : i32
    return %c0_i32, %c0_i32_0 : i32, i32
  }
  func.func @transform_3(%arg0: i32) -> (i32, i32) {
    %c0_i32 = arith.constant 0 : i32
    %c0_i32_0 = arith.constant 0 : i32
    %c0_i32_1 = arith.constant 0 : i32
    return %c0_i32, %c0_i32_0 : i32, i32
  }
  func.func @transform_4(%arg0: i32) -> (i32, i32) {
    %c0_i32 = arith.constant 0 : i32
    %c0_i32_0 = arith.constant 0 : i32
    %c0_i32_1 = arith.constant 0 : i32
    return %c0_i32, %c0_i32_0 : i32, i32
  }
  func.func @transform_5(%arg0: i32) -> (i32, i32) {
    %c0_i32 = arith.constant 0 : i32
    %c0_i32_0 = arith.constant 0 : i32
    %c0_i32_1 = arith.constant 0 : i32
    return %c0_i32, %c0_i32_0 : i32, i32
  }
  func.func @transform_6(%arg0: i32) -> (i32, i32) {
    %c0_i32 = arith.constant 0 : i32
    %c0_i32_0 = arith.constant 0 : i32
    %c0_i32_1 = arith.constant 0 : i32
    return %c0_i32, %c0_i32_0 : i32, i32
  }
  func.func @transform_7(%arg0: i32) -> (i32, i32) {
    %c0_i32 = arith.constant 0 : i32
    %c0_i32_0 = arith.constant 0 : i32
    %c0_i32_1 = arith.constant 0 : i32
    return %c0_i32, %c0_i32_0 : i32, i32
  }
  func.func @transform_8(%arg0: i32) -> (i32, i32) {
    %c0_i32 = arith.constant 0 : i32
    %c0_i32_0 = arith.constant 0 : i32
    %c0_i32_1 = arith.constant 0 : i32
    return %c0_i32, %c0_i32_0 : i32, i32
  }
  func.func @transform_9(%arg0: i32) -> (i32, i32) {
    %c0_i32 = arith.constant 0 : i32
    %c0_i32_0 = arith.constant 0 : i32
    return %arg0, %c0_i32 : i32, i32
  }
}

</mosaic_0001>

<bundles_post_ra>
// kernel: full_connected_forward.1
= control target key start
LH: loop header
LB: loop body
LE: loop exit
PB: predicated region body
PF: predicated region fallthrough
CT: control target
= control target key end

     0   :  { %14 = vsyncpa [#allocation3], 0  ;;  %s1131_s0 = inlined_call_operand.hbm [shape: f32[8,32], index: 0, kind: input, shape index: {}]   ;;  %s1132_s1 = inlined_call_operand.hbm [shape: f32[32,128], index: 1, kind: input, shape index: {}]   ;;  %s1133_s2 = inlined_call_operand.vmem [shape: f32[1,128], index: 2, kind: input, shape index: {}]   ;;  %s1134_s3 = inlined_call_operand.hbm [shape: f32[128,128], index: 3, kind: input, shape index: {}]   ;;  %s1135_s4 = inlined_call_operand.vmem [shape: f32[1,128], index: 4, kind: input, shape index: {}]   ;;  %s1136_s5 = inlined_call_operand.hbm [shape: f32[128,128], index: 5, kind: input, shape index: {}]   ;;  %s1137_s6 = inlined_call_operand.vmem [shape: f32[1,128], index: 6, kind: input, shape index: {}]   ;;  %s1138_s7 = inlined_call_operand.hbm [shape: f32[128,128], index: 7, kind: input, shape index: {}]   ;;  %s1139_s8 = inlined_call_operand.vmem [shape: f32[1,128], index: 8, kind: input, shape index: {}]   ;;  %s1140_s9 = inlined_call_operand.hbm [shape: f32[8,128], index: 9, kind: output, shape index: {}]  }
   0x1   :  { %15 = vsyncpa [#allocation6], 0 }
   0x2   :  { %16 = vsyncpa [#allocation9], 0 }
   0x3   :  { %17 = vsyncpa [#allocation4], 0  ;;  %s940_s30 = smov [#allocation5]   ;;  %s800_s13 = scalar_lea.hbm %s1132_s1, 512 }
   0x4   :  { %s33_s10 = sshll.u32 %s940_s30, 4  ;;  %p801_p0 = scmp.ne.s32.totalorder %s1132_s1, %s800_s13  ;;  %s34_s10 = int_to_ptr.vmem [resolvable:$true] %s33_s10 }
   0x5   :  { %p804_p1 = scmp.lt.u32.totalorder %s800_s13, %s1132_s1 }
   0x7   :  { %p806_p2 = pnand %p804_p1, %p801_p0 }
   0x9   :  { %809 = shalt.err (!%p806_p2)
}
   0xa   :  { %s810_s18 = scalar_lea.vmem %s34_s10, 512  ;;  %p815_p4 = scmp.lt.s32.totalorder %s34_s10, %s34_s10 }
   0xb   :  { %p811_p3 = scmp.ne.s32.totalorder %s34_s10, %s810_s18  ;;  %p816_p5 = scmp.lt.s32.totalorder %s810_s18, %s810_s18 }
   0xd   :  { %p817_p6 = por %p816_p5, %p815_p4 }
   0xf   :  { %p818_p7 = pnand %p817_p6, %p811_p3 }
  0x11   :  { %821 = shalt.err (!%p818_p7)
}
  0x12   :  { %s941_s19 = smov 128   ;;  %s942_s20 = smov 8  }
  0x13   :  { %39 = dma.hbm_to_vmem [thread:$0]  %s1132_s1, 512, %s34_s10, [#allocation6], %s941_s19, %s941_s19, %s942_s20  }
  0x14   :  { %s943_s23 = smov [#allocation8]   ;;  %s944_s25 = smov [#allocation2]  }
  0x15   :  { %s61_s24 = sshll.u32 %s943_s23, 4  ;;  %s24_s26 = sshll.u32 %s944_s25, 4  ;;  %s62_s24 = int_to_ptr.vmem [resolvable:$true] %s61_s24  ;;  %s25_s26 = int_to_ptr.vmem [resolvable:$true] %s24_s26 }
  0x16   :  { %s822_s29 = scalar_lea.hbm %s1136_s5, 2048 }
  0x17   :  { %p823_p8 = scmp.ne.s32.totalorder %s1136_s5, %s822_s29  ;;  %p826_p9 = scmp.lt.u32.totalorder %s822_s29, %s1136_s5 }
  0x19   :  { %p828_p10 = pnand %p826_p9, %p823_p8 }
  0x1b   :  { %831 = shalt.err (!%p828_p10)
}
  0x1c   :  { %s832_s1 = scalar_lea.vmem %s62_s24, 2048  ;;  %p837_p12 = scmp.lt.s32.totalorder %s62_s24, %s62_s24 }
  0x1d   :  { %p833_p11 = scmp.ne.s32.totalorder %s62_s24, %s832_s1  ;;  %p838_p13 = scmp.lt.s32.totalorder %s832_s1, %s832_s1 }
  0x1f   :  { %p839_p0 = por %p838_p13, %p837_p12 }
  0x21   :  { %p840_p1 = pnand %p839_p0, %p833_p11 }
  0x23   :  { %843 = shalt.err (!%p840_p1)
}
  0x24   :  { %67 = dma.hbm_to_vmem [thread:$0]  %s1136_s5, 2048, %s62_s24, [#allocation9], %s941_s19, %s941_s19, %s942_s20  }
  0x25   :  { %s844_s17 = scalar_lea.hbm %s1131_s0, 128 }
  0x26   :  { %p845_p2 = scmp.ne.s32.totalorder %s1131_s0, %s844_s17  ;;  %p848_p3 = scmp.lt.u32.totalorder %s844_s17, %s1131_s0 }
  0x28   :  { %p850_p4 = pnand %p848_p3, %p845_p2 }
  0x2a   :  { %853 = shalt.err (!%p850_p4)
}
  0x2b   :  { %s854_s25 = scalar_lea.vmem %s25_s26, 128  ;;  %p859_p6 = scmp.lt.s32.totalorder %s25_s26, %s25_s26 }
  0x2c   :  { %p855_p5 = scmp.ne.s32.totalorder %s25_s26, %s854_s25  ;;  %p860_p7 = scmp.lt.s32.totalorder %s854_s25, %s854_s25 }
  0x2e   :  { %p861_p8 = por %p860_p7, %p859_p6 }
  0x30   :  { %p862_p9 = pnand %p861_p8, %p855_p5 }
  0x32   :  { %865 = shalt.err (!%p862_p9)
}
  0x33   :  { %27 = dma.hbm_to_vmem [thread:$0]  %s1131_s0, 128, %s25_s26, [#allocation3]  }
  0x34   :  { %s945_s27 = smov [#allocation7]   ;;  %s946_s29 = smov [#allocation10]  }
  0x35   :  { %s47_s28 = sshll.u32 %s945_s27, 4  ;;  %s75_s30 = sshll.u32 %s946_s29, 4  ;;  %s48_s28 = int_to_ptr.vmem [resolvable:$true] %s47_s28  ;;  %s76_s30 = int_to_ptr.vmem [resolvable:$true] %s75_s30 }
  0x36   :  { %s866_s13 = scalar_lea.hbm %s1134_s3, 2048 }
  0x37   :  { %p867_p10 = scmp.ne.s32.totalorder %s1134_s3, %s866_s13  ;;  %p870_p11 = scmp.lt.u32.totalorder %s866_s13, %s1134_s3 }
  0x39   :  { %p872_p12 = pnand %p870_p11, %p867_p10 }
  0x3b   :  { %875 = shalt.err (!%p872_p12)
}
  0x3c   :  { %s876_s0 = scalar_lea.vmem %s48_s28, 2048  ;;  %p881_p0 = scmp.lt.s32.totalorder %s48_s28, %s48_s28 }
  0x3d   :  { %p877_p13 = scmp.ne.s32.totalorder %s48_s28, %s876_s0  ;;  %p882_p1 = scmp.lt.s32.totalorder %s876_s0, %s876_s0 }
  0x3f   :  { %p883_p2 = por %p882_p1, %p881_p0 }
  0x41   :  { %p884_p3 = pnand %p883_p2, %p877_p13 }
  0x43   :  { %887 = shalt.err (!%p884_p3)
}
  0x44   :  { %53 = dma.hbm_to_vmem [thread:$0]  %s1134_s3, 2048, %s48_s28, [#allocation6], %s941_s19, %s941_s19, %s942_s20  }
  0x45   :  { %s888_s21 = scalar_lea.hbm %s1138_s7, 2048 }
  0x46   :  { %p889_p4 = scmp.ne.s32.totalorder %s1138_s7, %s888_s21  ;;  %p892_p5 = scmp.lt.u32.totalorder %s888_s21, %s1138_s7 }
  0x48   :  { %p894_p6 = pnand %p892_p5, %p889_p4 }
  0x4a   :  { %897 = shalt.err (!%p894_p6)
}
  0x4b   :  { %s898_s24 = scalar_lea.vmem %s76_s30, 2048  ;;  %p903_p8 = scmp.lt.s32.totalorder %s76_s30, %s76_s30 }
  0x4c   :  { %p899_p7 = scmp.ne.s32.totalorder %s76_s30, %s898_s24  ;;  %p904_p9 = scmp.lt.s32.totalorder %s898_s24, %s898_s24 }
  0x4e   :  { %p905_p10 = por %p904_p9, %p903_p8 }
  0x50   :  { %p906_p11 = pnand %p905_p10, %p899_p7 }
  0x52   :  { %909 = shalt.err (!%p906_p11)
}
  0x53   :  { %81 = dma.hbm_to_vmem [thread:$0]  %s1138_s7, 2048, %s76_s30, [#allocation9], %s941_s19, %s941_s19, %s942_s20  }
  0x54   :  { %932 = dma.done.wait [#allocation3], 128  }
  0x55   :  { %933 = vsyncadd [#allocation3], 4294967168 }
  0x56   :  { %934 = dma.done.wait [#allocation6], 2560  }
  0x57   :  { %935 = vsyncadd [#allocation6], 4294964736 }
  0x58   :  { %936 = dma.done.wait [#allocation9], 4096  }
  0x59   :  { %937 = vsyncadd [#allocation9], 4294963200  ;;  %v947_v0 = vmov 0.0|0.0   ;;  %vm948_vm0 = vmmov 0   ;;  %v949_v1 = vmov 0.0   ;;  %v100_v2 = vld [vmem:[#allocation5] sm:$0xff] }
  0x5a   :  { %695 = vmatprep.subr.bf16.mxu0 %v947_v0  ;;  %587 = vmatprep.mubr.msk.f32.mxu0 %vm948_vm0, %v949_v1  ;;  %v101_v3 = vld [vmem:[#allocation5 + $0x8] sm:$0xff]  ;;  %v102_v4 = vld [vmem:[#allocation5 + $0x10] sm:$0xff]  ;;  %v103_v6 = vld [vmem:[#allocation5 + $0x18] sm:$0xff]  ;;  %vm111_vm1 = vcmask 261120   ;;  %s950_s30 = smov [#allocation11]  }
  0x5b   :  { %701 = vmatprep.subr.bf16.mxu1 %v947_v0  ;;  %622 = vmatprep.mubr.msk.f32.mxu1 %vm948_vm0, %v949_v1  ;;  %v696_v5 = vpack.c.bf16 %v101_v3, %v100_v2  ;;  %v699_v7 = vpack.c.bf16 %v103_v6, %v102_v4  ;;  %v99_v8 = vld [vmem:[#allocation2] sm:$0xff]  ;;  %v194_v13 = vld [vmem:[#allocation7] sm:$0xff]  ;;  %v195_v14 = vld [vmem:[#allocation7 + $0x8] sm:$0xff]  ;;  %s507_s11 = sshll.u32 %s950_s30, 4  ;;  %s508_s11 = int_to_ptr.vmem [resolvable:$true] %s507_s11 }
  0x5c   :  { %v518_v9 = vld [vmem:[%s1133_s2] ss:$0 sm:$0xff]  ;;  %v196_v15 = vld [vmem:[#allocation7 + $0x10] sm:$0xff]  ;;  %v702_v16 = vpack.c.bf16 %v195_v14, %v194_v13  ;;  %v198_v19 = vld [vmem:[#allocation7 + $0x20] sm:$0xff]  ;;  %s910_s12 = scalar_lea.vmem %s508_s11, 128  ;;  %p915_p13 = scmp.lt.s32.totalorder %s508_s11, %s508_s11 }
  0x5d   :  { %697 = vmatpush3.bf16.msra.mxu0 %v696_v5  ;;  %v197_v17 = vld [vmem:[#allocation7 + $0x18] sm:$0xff]  ;;  %v199_v20 = vld [vmem:[#allocation7 + $0x28] sm:$0xff]  ;;  %v200_v22 = vld [vmem:[#allocation7 + $0x30] sm:$0xff]  ;;  %p911_p12 = scmp.ne.s32.totalorder %s508_s11, %s910_s12  ;;  %p916_p0 = scmp.lt.s32.totalorder %s910_s12, %s910_s12 }
  0x5e   :  { %698 = vmatprep.subr.bf16.mxu0 %v947_v0  ;;  %703 = vmatpush3.bf16.msra.mxu1 %v702_v16  ;;  %v705_v18 = vpack.c.bf16 %v197_v17, %v196_v15  ;;  %v708_v21 = vpack.c.bf16 %v199_v20, %v198_v19  ;;  %v201_v23 = vld [vmem:[#allocation7 + $0x38] sm:$0xff]  ;;  %v202_v25 = vld [vmem:[#allocation7 + $0x40] sm:$0xff]  ;;  %v203_v26 = vld [vmem:[#allocation7 + $0x48] sm:$0xff] }
  0x5f   :  { %704 = vmatprep.subr.bf16.mxu1 %v947_v0  ;;  %v711_v24 = vpack.c.bf16 %v201_v23, %v200_v22  ;;  %v714_v27 = vpack.c.bf16 %v203_v26, %v202_v25  ;;  %v204_v32 = vld [vmem:[#allocation7 + $0x50] sm:$0xff]  ;;  %v205_v33 = vld [vmem:[#allocation7 + $0x58] sm:$0xff]  ;;  %v206_v35 = vld [vmem:[#allocation7 + $0x60] sm:$0xff]  ;;  %p917_p1 = por %p916_p0, %p915_p13 }
  0x60   :  { %v717_v34 = vpack.c.bf16 %v205_v33, %v204_v32  ;;  %v207_v36 = vld [vmem:[#allocation7 + $0x68] sm:$0xff]  ;;  %v208_v38 = vld [vmem:[#allocation7 + $0x70] sm:$0xff]  ;;  %v209_v39 = vld [vmem:[#allocation7 + $0x78] sm:$0xff] }
  0x61   :  { %700 = vmatpush3.bf16.msra.mxu0 %v699_v7  ;;  %v720_v37 = vpack.c.bf16 %v207_v36, %v206_v35  ;;  %v723_v40 = vpack.c.bf16 %v209_v39, %v208_v38  ;;  %v520_v44 = vld [vmem:[%s1135_s4] ss:$0 sm:$0xff]  ;;  %v296_v48 = vld [vmem:[#allocation8] sm:$0xff]  ;;  %v297_v49 = vld [vmem:[#allocation8 + $0x8] sm:$0xff]  ;;  %p918_p2 = pnand %p917_p1, %p911_p12 }
  0x62   :  { %725 = vmatprep.subr.bf16.mxu0 %v947_v0  ;;  %706 = vmatpush3.bf16.msra.mxu1 %v705_v18  ;;  %v298_v50 = vld [vmem:[#allocation8 + $0x10] sm:$0xff]  ;;  %v726_v51 = vpack.c.bf16 %v297_v49, %v296_v48  ;;  %v299_v52 = vld [vmem:[#allocation8 + $0x18] sm:$0xff]  ;;  %v300_v54 = vld [vmem:[#allocation8 + $0x20] sm:$0xff] }
  0x63   :  { %707 = vmatprep.subr.bf16.mxu1 %v947_v0  ;;  %v729_v53 = vpack.c.bf16 %v299_v52, %v298_v50  ;;  %v301_v55 = vld [vmem:[#allocation8 + $0x28] sm:$0xff]  ;;  %v302_v57 = vld [vmem:[#allocation8 + $0x30] sm:$0xff]  ;;  %v303_v58 = vld [vmem:[#allocation8 + $0x38] sm:$0xff] }
  0x64   :  { %588 = vmatmul.mubr.msk.f32.vlgmr.msra.gmra.mrb[0].mxu0 %vm111_vm1, %v99_v8  ;;  %v732_v56 = vpack.c.bf16 %v301_v55, %v300_v54  ;;  %v735_v59 = vpack.c.bf16 %v303_v58, %v302_v57  ;;  %v304_v60 = vld [vmem:[#allocation8 + $0x40] sm:$0xff]  ;;  %v305_v61 = vld [vmem:[#allocation8 + $0x48] sm:$0xff]  ;;  %v306_v4 = vld [vmem:[#allocation8 + $0x50] sm:$0xff] }
  0x65   :  { %657 = vmatprep.mubr.msk.f32.mxu0 %vm948_vm0, %v949_v1  ;;  %727 = vmatpush3.bf16.msra.mxu0 %v726_v51  ;;  %v738_v62 = vpack.c.bf16 %v305_v61, %v304_v60  ;;  %v307_v5 = vld [vmem:[#allocation8 + $0x58] sm:$0xff]  ;;  %v308_v7 = vld [vmem:[#allocation8 + $0x60] sm:$0xff]  ;;  %v309_v8 = vld [vmem:[#allocation8 + $0x68] sm:$0xff] }
  0x66   :  { %709 = vmatpush3.bf16.msra.mxu1 %v708_v21  ;;  %728 = vmatprep.subr.bf16.mxu0 %v947_v0  ;;  %v741_v6 = vpack.c.bf16 %v307_v5, %v306_v4  ;;  %v521_v16 = vld [vmem:[%s1137_s6] ss:$0 sm:$0xff]  ;;  %v398_v20 = vld [vmem:[#allocation10] sm:$0xff]  ;;  %v399_v21 = vld [vmem:[#allocation10 + $0x8] sm:$0xff] }
  0x67   :  { %710 = vmatprep.subr.bf16.mxu1 %v947_v0  ;;  %v400_v22 = vld [vmem:[#allocation10 + $0x10] sm:$0xff]  ;;  %v750_v23 = vpack.c.bf16 %v399_v21, %v398_v20  ;;  %v402_v26 = vld [vmem:[#allocation10 + $0x20] sm:$0xff]  ;;  %v407_v33 = vld [vmem:[#allocation10 + $0x48] sm:$0xff] }
  0x68   :  { %v406_v32 = vld [vmem:[#allocation10 + $0x40] sm:$0xff]  ;;  %v408_v39 = vld [vmem:[#allocation10 + $0x50] sm:$0xff]  ;;  %v522_v51 = vld [vmem:[%s1139_s8] ss:$0 sm:$0xff] }
  0x69   :  { %730 = vmatpush3.bf16.msra.mxu0 %v729_v53 }
  0x6a   :  { %712 = vmatpush3.bf16.msra.mxu1 %v711_v24  ;;  %731 = vmatprep.subr.bf16.mxu0 %v947_v0  ;;  %v401_v24 = vld [vmem:[#allocation10 + $0x18] sm:$0xff] }
  0x6b   :  { %713 = vmatprep.subr.bf16.mxu1 %v947_v0  ;;  %v753_v25 = vpack.c.bf16 %v401_v24, %v400_v22 }
  0x6d   :  { %733 = vmatpush3.bf16.msra.mxu0 %v732_v56 }
  0x6e   :  { %715 = vmatpush3.bf16.msra.mxu1 %v714_v27  ;;  %734 = vmatprep.subr.bf16.mxu0 %v947_v0  ;;  %v403_v27 = vld [vmem:[#allocation10 + $0x28] sm:$0xff] }
  0x6f   :  { %716 = vmatprep.subr.bf16.mxu1 %v947_v0 }
  0x71   :  { %736 = vmatpush3.bf16.msra.mxu0 %v735_v59 }
  0x72   :  { %718 = vmatpush3.bf16.msra.mxu1 %v717_v34  ;;  %737 = vmatprep.subr.bf16.mxu0 %v947_v0  ;;  %v762_v34 = vpack.c.bf16 %v407_v33, %v406_v32 }
  0x73   :  { %719 = vmatprep.subr.bf16.mxu1 %v947_v0 }
  0x75   :  { %739 = vmatpush3.bf16.msra.mxu0 %v738_v62 }
  0x76   :  { %721 = vmatpush3.bf16.msra.mxu1 %v720_v37  ;;  %740 = vmatprep.subr.bf16.mxu0 %v947_v0 }
  0x77   :  { %722 = vmatprep.subr.bf16.mxu1 %v947_v0 }
  0x79   :  { %742 = vmatpush3.bf16.msra.mxu0 %v741_v6 }
  0x7a   :  { %724 = vmatpush3.bf16.msra.mxu1 %v723_v40  ;;  %743 = vmatprep.subr.bf16.mxu0 %v947_v0  ;;  %v409_v40 = vld [vmem:[#allocation10 + $0x58] sm:$0xff] }
  0x7b   :  { %749 = vmatprep.subr.bf16.mxu1 %v947_v0 }
 0x137   :  { %v181_v10 = vpop.f32.mrb[0].mxu0 }
 0x138   :  { %v182_v11 = vadd.f32 %v518_v9, %v181_v10  ;;  %v589_v12 = vpop.f32.mrb[1].mxu0  ;;  %v744_v9 = vpack.c.bf16 %v309_v8, %v308_v7  ;;  %v310_v10 = vld [vmem:[#allocation8 + $0x70] sm:$0xff] }
 0x13a   :  { %185 = vmax.xlane.f32.xlu0 %v182_v11  ;;  %745 = vmatpush3.bf16.msra.mxu0 %v744_v9 }
 0x13b   :  { %746 = vmatprep.subr.bf16.mxu0 %v947_v0 }
 0x1c7   :  { %v186_v28 = vpop.xlane.xlu0 %185 }
 0x1c8   :  { %v187_v29 = vsub.f32 %v182_v11, %v186_v28  ;;  %v311_v11 = vld [vmem:[#allocation8 + $0x78] sm:$0xff]  ;;  %v756_v28 = vpack.c.bf16 %v403_v27, %v402_v26 }
 0x1c9   :  { %v747_v12 = vpack.c.bf16 %v311_v11, %v310_v10 }
 0x1ca   :  { %v188_v30 = vmul.f32 1.442695, %v187_v29  ;;  %v404_v29 = vld [vmem:[#allocation10 + $0x30] sm:$0xff] }
 0x1cb   :  { %748 = vmatpush3.bf16.msra.mxu0 %v747_v12 }
 0x1cc   :  { %784 = vpow2.f32 %v188_v30  ;;  %v405_v30 = vld [vmem:[#allocation10 + $0x38] sm:$0xff] }
 0x1d6   :  { %v785_v31 = vpop.eup %784 }
 0x1d7   :  { %190 = vadd.xlane.f32.xlu0 %v785_v31 }
 0x264   :  { %v191_v41 = vpop.xlane.xlu0 %190 }
 0x265   :  { %786 = vrcp.f32 %v191_v41  ;;  %v765_v41 = vpack.c.bf16 %v409_v40, %v408_v39 }
 0x26f   :  { %v787_v42 = vpop.eup %786 }
 0x270   :  { %v193_v43 = vmul.f32 %v787_v42, %v785_v31  ;;  %v759_v31 = vpack.c.bf16 %v405_v30, %v404_v29  ;;  %v410_v42 = vld [vmem:[#allocation10 + $0x60] sm:$0xff] }
 0x272   :  { %623 = vmatmul.mubr.f32.vlgmr.msra.gmra.mrb[0].mxu1 %v193_v43  ;;  %v411_v43 = vld [vmem:[#allocation10 + $0x68] sm:$0xff] }
 0x273   :  { %692 = vmatprep.mubr.msk.f32.mxu1 %vm948_vm0, %v949_v1  ;;  %751 = vmatpush3.bf16.msra.mxu1 %v750_v23 }
 0x274   :  { %752 = vmatprep.subr.bf16.mxu1 %v947_v0 }
 0x277   :  { %754 = vmatpush3.bf16.msra.mxu1 %v753_v25 }
 0x278   :  { %755 = vmatprep.subr.bf16.mxu1 %v947_v0 }
 0x27b   :  { %757 = vmatpush3.bf16.msra.mxu1 %v756_v28 }
 0x27c   :  { %758 = vmatprep.subr.bf16.mxu1 %v947_v0 }
 0x27f   :  { %760 = vmatpush3.bf16.msra.mxu1 %v759_v31 }
 0x280   :  { %761 = vmatprep.subr.bf16.mxu1 %v947_v0 }
 0x283   :  { %763 = vmatpush3.bf16.msra.mxu1 %v762_v34 }
 0x284   :  { %764 = vmatprep.subr.bf16.mxu1 %v947_v0 }
 0x287   :  { %766 = vmatpush3.bf16.msra.mxu1 %v765_v41 }
 0x288   :  { %767 = vmatprep.subr.bf16.mxu1 %v947_v0 }
 0x345   :  { %v283_v45 = vpop.f32.mrb[0].mxu1 }
 0x346   :  { %v284_v46 = vadd.f32 %v520_v44, %v283_v45  ;;  %v624_v47 = vpop.f32.mrb[1].mxu1  ;;  %v768_v44 = vpack.c.bf16 %v411_v43, %v410_v42  ;;  %v412_v45 = vld [vmem:[#allocation10 + $0x70] sm:$0xff] }
 0x348   :  { %287 = vmax.xlane.f32.xlu1 %v284_v46  ;;  %769 = vmatpush3.bf16.msra.mxu1 %v768_v44 }
 0x349   :  { %770 = vmatprep.subr.bf16.mxu1 %v947_v0 }
 0x3d5   :  { %v288_v63 = vpop.xlane.xlu1 %287 }
 0x3d6   :  { %v289_v1 = vsub.f32 %v284_v46, %v288_v63  ;;  %v413_v46 = vld [vmem:[#allocation10 + $0x78] sm:$0xff] }
 0x3d7   :  { %v771_v47 = vpack.c.bf16 %v413_v46, %v412_v45 }
 0x3d8   :  { %v290_v2 = vmul.f32 1.442695, %v289_v1 }
 0x3d9   :  { %772 = vmatpush3.bf16.msra.mxu1 %v771_v47 }
 0x3da   :  { %788 = vpow2.f32 %v290_v2 }
 0x3e4   :  { %v789_v3 = vpop.eup %788 }
 0x3e5   :  { %292 = vadd.xlane.f32.xlu1 %v789_v3 }
 0x472   :  { %v293_v13 = vpop.xlane.xlu1 %292 }
 0x473   :  { %790 = vrcp.f32 %v293_v13 }
 0x47d   :  { %v791_v14 = vpop.eup %790 }
 0x47e   :  { %v295_v15 = vmul.f32 %v791_v14, %v789_v3 }
 0x480   :  { %658 = vmatmul.mubr.f32.vlgmr.msra.gmra.mrb[2].mxu0 %v295_v15 }
 0x553   :  { %v385_v17 = vpop.f32.mrb[2].mxu0 }
 0x554   :  { %v386_v18 = vadd.f32 %v521_v16, %v385_v17  ;;  %v659_v19 = vpop.f32.mrb[3].mxu0 }
 0x556   :  { %389 = vmax.xlane.f32.xlu0 %v386_v18 }
 0x5e3   :  { %v390_v35 = vpop.xlane.xlu0 %389 }
 0x5e4   :  { %v391_v36 = vsub.f32 %v386_v18, %v390_v35 }
 0x5e6   :  { %v392_v37 = vmul.f32 1.442695, %v391_v36 }
 0x5e8   :  { %792 = vpow2.f32 %v392_v37 }
 0x5f2   :  { %v793_v38 = vpop.eup %792 }
 0x5f3   :  { %394 = vadd.xlane.f32.xlu1 %v793_v38 }
 0x680   :  { %v395_v48 = vpop.xlane.xlu1 %394 }
 0x681   :  { %794 = vrcp.f32 %v395_v48 }
 0x68b   :  { %v795_v49 = vpop.eup %794 }
 0x68c   :  { %v397_v50 = vmul.f32 %v795_v49, %v793_v38 }
 0x68e   :  { %693 = vmatmul.mubr.f32.vlgmr.msra.gmra.mrb[2].mxu1 %v397_v50 }
 0x761   :  { %v487_v52 = vpop.f32.mrb[2].mxu1 }
 0x762   :  { %v488_v53 = vadd.f32 %v522_v51, %v487_v52  ;;  %v694_v54 = vpop.f32.mrb[3].mxu1 }
 0x764   :  { %491 = vmax.xlane.f32.xlu0 %v488_v53 }
 0x7f1   :  { %v492_v55 = vpop.xlane.xlu0 %491 }
 0x7f2   :  { %v493_v56 = vsub.f32 %v488_v53, %v492_v55 }
 0x7f4   :  { %v494_v57 = vmul.f32 1.442695, %v493_v56 }
 0x7f6   :  { %796 = vpow2.f32 %v494_v57 }
 0x800   :  { %v797_v58 = vpop.eup %796 }
 0x801   :  { %496 = vadd.xlane.f32.xlu1 %v797_v58 }
 0x88e   :  { %v497_v0 = vpop.xlane.xlu1 %496 }
 0x88f   :  { %798 = vrcp.f32 %v497_v0 }
 0x899   :  { %v799_v59 = vpop.eup %798 }
 0x89a   :  { %v499_v60 = vmul.f32 %v799_v59, %v797_v58 }
 0x89c   :  { %500 = vst [vmem:[#allocation11] sm:$0xff] %v499_v60 }
 0x89d   :  { %921 = shalt.err (!%p918_p2)
}
 0x89e   :  { %s922_s1 = scalar_lea.hbm %s1140_s9, 128 }
 0x89f   :  { %p923_p3 = scmp.ne.s32.totalorder %s1140_s9, %s922_s1  ;;  %p926_p4 = scmp.lt.u32.totalorder %s922_s1, %s1140_s9 }
 0x8a1   :  { %p928_p5 = pnand %p926_p4, %p923_p3 }
 0x8a3   :  { %931 = shalt.err (!%p928_p5)
}
 0x8a4   :  { %510 = dma.vmem_to_hbm [thread:$0]  %s508_s11, 128, %s1140_s9, [#allocation4]  }
 0x8a5   :  { %938 = dma.done.wait [#allocation4], 128  }
 0x8a6   :  { %939 = vsyncadd [#allocation4], 4294967168 }
 0x8a7   :  { %514 = vsyncpa [#allocation3], 1 }
 0x8a8   :  { %515 = vsyncpa [#allocation6], 1 }
 0x8a9   :  { %516 = vsyncpa [#allocation9], 1 }
 0x8aa   :  { %517 = vsyncpa [#allocation4], 1 }

</bundles_post_ra>
